<compile_context>
chip_gen: v6e
topology: v6e:2x2x1
jax: 0.10.0
libtpu: 0.0.40
codegen_flags: <defaults>
</compile_context>

<pallas_src>
import functools

import jax
import jax.numpy as jnp
from jax.experimental import pallas as pl
from jax.experimental.pallas import tpu as pltpu


def _round_up(x, m):
    return (x + m - 1) // m * m


_HAS_BUFFERED = hasattr(pl, "Buffered")


def _pinned_spec(shape):
    """Constant-index block: single-buffered (its window never changes)."""
    index_map = lambda i: (0,) * len(shape)
    if _HAS_BUFFERED:
        try:
            return pl.BlockSpec(shape, index_map, pipeline_mode=pl.Buffered(1))
        except TypeError:  # BlockSpec without pipeline_mode support
            pass
    return pl.BlockSpec(shape, index_map)


def _vmem_cap_bytes():
    """~3/4 of physical VMEM: ~48 MiB on v7x, ~96 MiB on v5e/v6e."""
    try:
        cap = int(pltpu.get_tpu_info().vmem_capacity_bytes)
    except Exception:
        cap = 64 * 1024 * 1024  # conservative (v7x-sized) fallback
    return cap * 3 // 4


def _attn_step_bytes(tq, d_in_p, d_out_p, lk_p):
    bf16, f32 = 2, 4
    return (
        2 * tq * d_in_p * bf16            # q_in tile (double-buffered)
        + d_in_p * d_out_p * bf16         # Wq (pinned, single-buffered)
        + d_out_p * f32                   # bq
        + 2 * lk_p * d_out_p * bf16       # K_proj + V_proj (pinned, single)
        + 2 * tq * d_out_p * f32          # out tile (double-buffered)
        + 2 * tq * lk_p * f32             # attn tile (double-buffered)
        + tq * d_out_p * f32              # q f32 intermediate
        + 3 * tq * lk_p * f32             # scores / e / weights f32
    )


def _proj_step_bytes(tr, d_in_p, d_out_p):
    bf16, f32 = 2, 4
    return (
        2 * 2 * tr * d_in_p * bf16        # k_in, v_in tiles (double-buffered)
        + 2 * d_in_p * d_out_p * bf16     # Wk, Wv (pinned, single-buffered)
        + 2 * d_out_p * f32               # bk, bv
        + 2 * 2 * tr * d_out_p * bf16     # k_out, v_out tiles (double-buffered)
        + 2 * tr * d_out_p * f32          # f32 projection intermediates
    )


def _kv_projection_kernel(k_in_ref, v_in_ref, wk_ref, bk_ref, wv_ref, bv_ref,
                          k_out_ref, v_out_ref):
    # bf16 MXU operands, f32 accumulation + f32 bias, cast to bf16 right away
    # (keeps the largest intermediates half-width).
    k = jnp.dot(k_in_ref[...], wk_ref[...],
                preferred_element_type=jnp.float32) + bk_ref[...]
    v = jnp.dot(v_in_ref[...], wv_ref[...],
                preferred_element_type=jnp.float32) + bv_ref[...]
    k_out_ref[...] = k.astype(k_out_ref.dtype)
    v_out_ref[...] = v.astype(v_out_ref.dtype)


def _attention_kernel(q_in_ref, wq_ref, bq_ref, k_ref, v_ref,
                      out_ref, attn_ref, *, lk_actual):
    # Q projection: computed exactly once per query tile (K/V are pre-projected).
    q = jnp.dot(q_in_ref[...], wq_ref[...],
                preferred_element_type=jnp.float32) + bq_ref[...]

    # scores = Q @ K^T without materializing the transpose (NT dot_general).
    scores = jax.lax.dot_general(
        q.astype(jnp.bfloat16), k_ref[...],
        dimension_numbers=(((1,), (1,)), ((), ())),
        preferred_element_type=jnp.float32)

    # Mask padded key columns so they carry no probability mass.
    col = jax.lax.broadcasted_iota(jnp.int32, scores.shape, 1)
    scores = jnp.where(col < lk_actual, scores, jnp.float32(-1e30))

    # Numerically-stable softmax in f32; denominator via EUP approx reciprocal.
    m = jnp.max(scores, axis=-1, keepdims=True)
    e = jnp.exp(scores - m)
    denom = jnp.sum(e, axis=-1, keepdims=True)
    weights = e * pl.reciprocal(denom, approx=True)

    attn_ref[...] = weights.astype(attn_ref.dtype)

    # weighted_values = weights @ V (bf16 MXU operands, f32 accumulation).
    out_ref[...] = jnp.dot(weights.astype(jnp.bfloat16), v_ref[...],
                           preferred_element_type=jnp.float32
                           ).astype(out_ref.dtype)


@jax.jit
def attention_layer(queries, keys, values, wq, bq, wk, bk, wv, bv):
    Lq, d_in = queries.shape
    Lk = keys.shape[0]
    d_out = wq.shape[1]

    # TPU-friendly padded shapes: lanes (last dim) -> 128 (lane-dense stores),
    # key rows -> 128 (lane-dense attention-weights output).
    d_in_p = _round_up(d_in, 128)
    d_out_p = _round_up(d_out, 128)
    lk_p = _round_up(Lk, 128)

    vmem_cap = _vmem_cap_bytes()

    # Query tile: 256 feeds full MXU rows on v6e/v7x; back off to 128 only if
    # the resident-VMEM estimate exceeds this generation's cap.
    if Lq < 128:
        tq = _round_up(Lq, 16)   # bf16 sublane packing is (16, 128)
    else:
        tq = 256 if Lq >= 256 else 128
        while tq > 128 and _attn_step_bytes(tq, d_in_p, d_out_p, lk_p) > vmem_cap:
            tq //= 2
    lq_p = _round_up(Lq, tq)

    def pad2(x, r, c, dtype):
        return jnp.zeros((r, c), dtype).at[:x.shape[0], :x.shape[1]].set(
            x.astype(dtype))

    q_p = pad2(queries, lq_p, d_in_p, jnp.bfloat16)
    k_in_p = pad2(keys, lk_p, d_in_p, jnp.bfloat16)
    v_in_p = pad2(values, lk_p, d_in_p, jnp.bfloat16)
    wq_p = pad2(wq, d_in_p, d_out_p, jnp.bfloat16)
    wk_p = pad2(wk, d_in_p, d_out_p, jnp.bfloat16)
    wv_p = pad2(wv, d_in_p, d_out_p, jnp.bfloat16)
    bq_p = pad2(bq, 1, d_out_p, jnp.float32)
    bk_p = pad2(bk, 1, d_out_p, jnp.float32)
    bv_p = pad2(bv, 1, d_out_p, jnp.float32)

    # ---------------- Kernel 1: K/V projections (computed exactly once) -----
    tr = 256 if lk_p % 256 == 0 else 128
    proj_est = _proj_step_bytes(tr, d_in_p, d_out_p)
    proj_vmem = int(min(vmem_cap, max(2 * proj_est, 32 * 1024 * 1024)))
    proj_cost = pl.CostEstimate(
        flops=4 * lk_p * d_in_p * d_out_p,
        transcendentals=0,
        bytes_accessed=(2 * lk_p * d_in_p + 2 * d_in_p * d_out_p
                        + 2 * lk_p * d_out_p) * 2 + 2 * d_out_p * 4)

    kv_in_spec = pl.BlockSpec((tr, d_in_p), lambda i: (i, 0))
    kv_out_spec = pl.BlockSpec((tr, d_out_p), lambda i: (i, 0))

    k_proj, v_proj = pl.pallas_call(
        _kv_projection_kernel,
        grid=(lk_p // tr,),
        in_specs=[
            kv_in_spec, kv_in_spec,                       # keys, values (tiled)
            _pinned_spec((d_in_p, d_out_p)), _pinned_spec((1, d_out_p)),  # Wk, bk
            _pinned_spec((d_in_p, d_out_p)), _pinned_spec((1, d_out_p)),  # Wv, bv
        ],
        out_specs=(kv_out_spec, kv_out_spec),
        out_shape=(jax.ShapeDtypeStruct((lk_p, d_out_p), jnp.bfloat16),
                   jax.ShapeDtypeStruct((lk_p, d_out_p), jnp.bfloat16)),
        compiler_params=pltpu.CompilerParams(
            dimension_semantics=("parallel",),
            vmem_limit_bytes=proj_vmem),
        cost_estimate=proj_cost,
    )(k_in_p, v_in_p, wk_p, bk_p, wv_p, bv_p)

    # ---------------- Kernel 2: attention over query tiles ------------------
    attn_est = _attn_step_bytes(tq, d_in_p, d_out_p, lk_p)
    attn_vmem = int(min(vmem_cap, max(2 * attn_est, 32 * 1024 * 1024)))
    attn_cost = pl.CostEstimate(
        flops=2 * lq_p * d_in_p * d_out_p       # Q projection
              + 4 * lq_p * lk_p * d_out_p,      # QK^T + PV
        transcendentals=lq_p * lk_p,
        bytes_accessed=(lq_p * d_in_p + d_in_p * d_out_p
                        + 2 * lk_p * d_out_p) * 2
                       + d_out_p * 4
                       + (lq_p * d_out_p + lq_p * lk_p) * 4)

    out_p, attn_p = pl.pallas_call(
        functools.partial(_attention_kernel, lk_actual=Lk),
        grid=(lq_p // tq,),
        in_specs=[
            pl.BlockSpec((tq, d_in_p), lambda i: (i, 0)),   # queries (tiled)
            _pinned_spec((d_in_p, d_out_p)),                # Wq
            _pinned_spec((1, d_out_p)),                     # bq
            _pinned_spec((lk_p, d_out_p)),                  # K_proj (bf16)
            _pinned_spec((lk_p, d_out_p)),                  # V_proj (bf16)
        ],
        out_specs=(
            pl.BlockSpec((tq, d_out_p), lambda i: (i, 0)),  # weighted values
            pl.BlockSpec((tq, lk_p), lambda i: (i, 0)),     # attention weights
        ),
        out_shape=(
            jax.ShapeDtypeStruct((lq_p, d_out_p), jnp.float32),
            jax.ShapeDtypeStruct((lq_p, lk_p), jnp.float32),
        ),
        compiler_params=pltpu.CompilerParams(
            dimension_semantics=("parallel",),
            vmem_limit_bytes=attn_vmem),
        cost_estimate=attn_cost,
    )(q_p, wq_p, bq_p, k_proj, v_proj)

    return out_p[:Lq, :d_out], attn_p[:Lq, :Lk]


def _init_linear(key, in_features, out_features):
    """Deterministic init mimicking nn.Linear (uniform +/- 1/sqrt(in))."""
    kw, kb = jax.random.split(key)
    bound = 1.0 / jnp.sqrt(float(in_features))
    # Stored pre-transposed: [in_features, out_features]
    w = jax.random.uniform(kw, (in_features, out_features),
                           minval=-bound, maxval=bound, dtype=jnp.float32)
    b = jax.random.uniform(kb, (1, out_features),
                           minval=-bound, maxval=bound, dtype=jnp.float32)
    return w, b


def _reference(queries, keys, values, wq, bq, wk, bk, wv, bv):
    q = queries @ wq + bq
    k = keys @ wk + bk
    v = values @ wv + bv
    scores = q @ k.T
    w = jax.nn.softmax(scores, axis=-1)
    return w @ v, w


if __name__ == "__main__":
    in_features = 32
    out_features = 32
    Lq, Lk = 8, 8  # seq lengths for queries and keys/values

    root = jax.random.PRNGKey(0)
    kq, kk, kv, kwq, kwk, kwv = jax.random.split(root, 6)

    queries = jax.random.normal(kq, (Lq, in_features), dtype=jnp.float32)
    keys = jax.random.normal(kk, (Lk, in_features), dtype=jnp.float32)
    values = jax.random.normal(kv, (Lk, in_features), dtype=jnp.float32)

    wq, bq = _init_linear(kwq, in_features, out_features)
    wk, bk = _init_linear(kwk, in_features, out_features)
    wv, bv = _init_linear(kwv, in_features, out_features)

    weighted_values, attention_weights = attention_layer(
        queries, keys, values, wq, bq, wk, bk, wv, bv)
    jax.block_until_ready((weighted_values, attention_weights))

    ref_out, ref_w = _reference(queries, keys, values, wq, bq, wk, bk, wv, bv)
    # bf16 MXU operands + approx reciprocal loosen the tolerance vs f32 ref.
    assert weighted_values.shape == ref_out.shape
    assert attention_weights.shape == ref_w.shape
    assert jnp.allclose(weighted_values, ref_out, atol=3e-2, rtol=3e-2)
    assert jnp.allclose(attention_weights, ref_w, atol=3e-2, rtol=3e-2)
    # softmax rows should still sum to ~1 despite the approx reciprocal.
    assert jnp.allclose(attention_weights.sum(-1), 1.0, atol=5e-3)

    print("KERNEL_OK")
</pallas_src>

<mosaic_0001>
module attributes {stable_mosaic.version = 11 : i64} {
  func.func @_kv_projection_kernel(%arg0: i32, %arg1: memref<128x128xbf16, #tpu.memory_space<vmem>>, %arg2: memref<128x128xbf16, #tpu.memory_space<vmem>>, %arg3: memref<128x128xbf16, #tpu.memory_space<vmem>>, %arg4: memref<1x128xf32, #tpu.memory_space<vmem>>, %arg5: memref<128x128xbf16, #tpu.memory_space<vmem>>, %arg6: memref<1x128xf32, #tpu.memory_space<vmem>>, %arg7: memref<128x128xbf16, #tpu.memory_space<vmem>>, %arg8: memref<128x128xbf16, #tpu.memory_space<vmem>>) attributes {dimension_semantics = [#tpu.dimension_semantics<parallel>], iteration_bounds = array<i64: 1>, scalar_prefetch = 0 : i64, scratch_operands = 0 : i64, tpu.core_type = #tpu.core_type<tc>, window_params = [{transform_indices = @transform_0, window_bounds = array<i64: 128, 128>}, {transform_indices = @transform_1, window_bounds = array<i64: 128, 128>}, {pipeline_mode = #tpu.pipeline_mode<synchronous>, transform_indices = @transform_2, window_bounds = array<i64: 128, 128>}, {pipeline_mode = #tpu.pipeline_mode<synchronous>, transform_indices = @transform_3, window_bounds = array<i64: 1, 128>}, {pipeline_mode = #tpu.pipeline_mode<synchronous>, transform_indices = @transform_4, window_bounds = array<i64: 128, 128>}, {pipeline_mode = #tpu.pipeline_mode<synchronous>, transform_indices = @transform_5, window_bounds = array<i64: 1, 128>}, {transform_indices = @transform_6, window_bounds = array<i64: 128, 128>}, {transform_indices = @transform_7, window_bounds = array<i64: 128, 128>}]} {
    %c0 = arith.constant 0 : index
    %c0_0 = arith.constant 0 : index
    %0 = vector.load %arg1[%c0, %c0_0] : memref<128x128xbf16, #tpu.memory_space<vmem>>, vector<128x128xbf16>
    %c0_1 = arith.constant 0 : index
    %c0_2 = arith.constant 0 : index
    %1 = vector.load %arg3[%c0_1, %c0_2] : memref<128x128xbf16, #tpu.memory_space<vmem>>, vector<128x128xbf16>
    %cst = arith.constant dense<0.000000e+00> : vector<128x128xf32>
    %2 = tpu.matmul %0, %1, %cst {dimension_numbers = #tpu.dot_dimension_numbers<[1], [0], [0], [1], [0, 0, 1, 1], [], []>} : vector<128x128xbf16>, vector<128x128xbf16>, vector<128x128xf32> -> vector<128x128xf32>
    %c0_3 = arith.constant 0 : index
    %c0_4 = arith.constant 0 : index
    %3 = vector.load %arg4[%c0_3, %c0_4] : memref<1x128xf32, #tpu.memory_space<vmem>>, vector<1x128xf32>
    %4 = vector.broadcast %3 : vector<1x128xf32> to vector<128x128xf32>
    %5 = arith.addf %2, %4 : vector<128x128xf32>
    %c0_5 = arith.constant 0 : index
    %c0_6 = arith.constant 0 : index
    %6 = vector.load %arg2[%c0_5, %c0_6] : memref<128x128xbf16, #tpu.memory_space<vmem>>, vector<128x128xbf16>
    %c0_7 = arith.constant 0 : index
    %c0_8 = arith.constant 0 : index
    %7 = vector.load %arg5[%c0_7, %c0_8] : memref<128x128xbf16, #tpu.memory_space<vmem>>, vector<128x128xbf16>
    %cst_9 = arith.constant dense<0.000000e+00> : vector<128x128xf32>
    %8 = tpu.matmul %6, %7, %cst_9 {dimension_numbers = #tpu.dot_dimension_numbers<[1], [0], [0], [1], [0, 0, 1, 1], [], []>} : vector<128x128xbf16>, vector<128x128xbf16>, vector<128x128xf32> -> vector<128x128xf32>
    %c0_10 = arith.constant 0 : index
    %c0_11 = arith.constant 0 : index
    %9 = vector.load %arg6[%c0_10, %c0_11] : memref<1x128xf32, #tpu.memory_space<vmem>>, vector<1x128xf32>
    %10 = vector.broadcast %9 : vector<1x128xf32> to vector<128x128xf32>
    %11 = arith.addf %8, %10 : vector<128x128xf32>
    %12 = arith.truncf %5 : vector<128x128xf32> to vector<128x128xbf16>
    %c0_12 = arith.constant 0 : index
    %c0_13 = arith.constant 0 : index
    %13 = vector.load %arg7[%c0_12, %c0_13] : memref<128x128xbf16, #tpu.memory_space<vmem>>, vector<128x128xbf16>
    tpu.vector_store %arg7[%c0_12, %c0_13], %12 {strides = array<i32>} : memref<128x128xbf16, #tpu.memory_space<vmem>>, vector<128x128xbf16>,
    %14 = arith.truncf %11 : vector<128x128xf32> to vector<128x128xbf16>
    %c0_14 = arith.constant 0 : index
    %c0_15 = arith.constant 0 : index
    %15 = vector.load %arg8[%c0_14, %c0_15] : memref<128x128xbf16, #tpu.memory_space<vmem>>, vector<128x128xbf16>
    tpu.vector_store %arg8[%c0_14, %c0_15], %14 {strides = array<i32>} : memref<128x128xbf16, #tpu.memory_space<vmem>>, vector<128x128xbf16>,
    return
  }
  func.func @transform_0(%arg0: i32) -> (i32, i32) {
    %c0_i32 = arith.constant 0 : i32
    %c0_i32_0 = arith.constant 0 : i32
    return %arg0, %c0_i32 : i32, i32
  }
  func.func @transform_1(%arg0: i32) -> (i32, i32) {
    %c0_i32 = arith.constant 0 : i32
    %c0_i32_0 = arith.constant 0 : i32
    return %arg0, %c0_i32 : i32, i32
  }
  func.func @transform_2(%arg0: i32) -> (i32, i32) {
    %c0_i32 = arith.constant 0 : i32
    %c0_i32_0 = arith.constant 0 : i32
    %c0_i32_1 = arith.constant 0 : i32
    return %c0_i32, %c0_i32_0 : i32, i32
  }
  func.func @transform_3(%arg0: i32) -> (i32, i32) {
    %c0_i32 = arith.constant 0 : i32
    %c0_i32_0 = arith.constant 0 : i32
    %c0_i32_1 = arith.constant 0 : i32
    return %c0_i32, %c0_i32_0 : i32, i32
  }
  func.func @transform_4(%arg0: i32) -> (i32, i32) {
    %c0_i32 = arith.constant 0 : i32
    %c0_i32_0 = arith.constant 0 : i32
    %c0_i32_1 = arith.constant 0 : i32
    return %c0_i32, %c0_i32_0 : i32, i32
  }
  func.func @transform_5(%arg0: i32) -> (i32, i32) {
    %c0_i32 = arith.constant 0 : i32
    %c0_i32_0 = arith.constant 0 : i32
    %c0_i32_1 = arith.constant 0 : i32
    return %c0_i32, %c0_i32_0 : i32, i32
  }
  func.func @transform_6(%arg0: i32) -> (i32, i32) {
    %c0_i32 = arith.constant 0 : i32
    %c0_i32_0 = arith.constant 0 : i32
    return %arg0, %c0_i32 : i32, i32
  }
  func.func @transform_7(%arg0: i32) -> (i32, i32) {
    %c0_i32 = arith.constant 0 : i32
    %c0_i32_0 = arith.constant 0 : i32
    return %arg0, %c0_i32 : i32, i32
  }
}

module attributes {stable_mosaic.version = 11 : i64} {
  func.func @_attention_kernel(%arg0: i32, %arg1: memref<16x128xbf16, #tpu.memory_space<vmem>>, %arg2: memref<128x128xbf16, #tpu.memory_space<vmem>>, %arg3: memref<1x128xf32, #tpu.memory_space<vmem>>, %arg4: memref<128x128xbf16, #tpu.memory_space<vmem>>, %arg5: memref<128x128xbf16, #tpu.memory_space<vmem>>, %arg6: memref<16x128xf32, #tpu.memory_space<vmem>>, %arg7: memref<16x128xf32, #tpu.memory_space<vmem>>) attributes {dimension_semantics = [#tpu.dimension_semantics<parallel>], iteration_bounds = array<i64: 1>, scalar_prefetch = 0 : i64, scratch_operands = 0 : i64, tpu.core_type = #tpu.core_type<tc>, window_params = [{transform_indices = @transform_0, window_bounds = array<i64: 16, 128>}, {pipeline_mode = #tpu.pipeline_mode<synchronous>, transform_indices = @transform_1, window_bounds = array<i64: 128, 128>}, {pipeline_mode = #tpu.pipeline_mode<synchronous>, transform_indices = @transform_2, window_bounds = array<i64: 1, 128>}, {pipeline_mode = #tpu.pipeline_mode<synchronous>, transform_indices = @transform_3, window_bounds = array<i64: 128, 128>}, {pipeline_mode = #tpu.pipeline_mode<synchronous>, transform_indices = @transform_4, window_bounds = array<i64: 128, 128>}, {transform_indices = @transform_5, window_bounds = array<i64: 16, 128>}, {transform_indices = @transform_6, window_bounds = array<i64: 16, 128>}]} {
    %c0 = arith.constant 0 : index
    %c0_0 = arith.constant 0 : index
    %0 = vector.load %arg1[%c0, %c0_0] : memref<16x128xbf16, #tpu.memory_space<vmem>>, vector<16x128xbf16>
    %c0_1 = arith.constant 0 : index
    %c0_2 = arith.constant 0 : index
    %1 = vector.load %arg2[%c0_1, %c0_2] : memref<128x128xbf16, #tpu.memory_space<vmem>>, vector<128x128xbf16>
    %cst = arith.constant dense<0.000000e+00> : vector<16x128xf32>
    %2 = tpu.matmul %0, %1, %cst {dimension_numbers = #tpu.dot_dimension_numbers<[1], [0], [0], [1], [0, 0, 1, 1], [], []>} : vector<16x128xbf16>, vector<128x128xbf16>, vector<16x128xf32> -> vector<16x128xf32>
    %c0_3 = arith.constant 0 : index
    %c0_4 = arith.constant 0 : index
    %3 = vector.load %arg3[%c0_3, %c0_4] : memref<1x128xf32, #tpu.memory_space<vmem>>, vector<1x128xf32>
    %4 = vector.broadcast %3 : vector<1x128xf32> to vector<16x128xf32>
    %5 = arith.addf %2, %4 : vector<16x128xf32>
    %6 = arith.truncf %5 : vector<16x128xf32> to vector<16x128xbf16>
    %c0_5 = arith.constant 0 : index
    %c0_6 = arith.constant 0 : index
    %7 = vector.load %arg4[%c0_5, %c0_6] : memref<128x128xbf16, #tpu.memory_space<vmem>>, vector<128x128xbf16>
    %cst_7 = arith.constant dense<0.000000e+00> : vector<16x128xf32>
    %8 = tpu.matmul %6, %7, %cst_7 {dimension_numbers = #tpu.dot_dimension_numbers<[1], [1], [0], [0], [0, 0, 1, 0], [], []>} : vector<16x128xbf16>, vector<128x128xbf16>, vector<16x128xf32> -> vector<16x128xf32>
    %9 = tpu.iota {dimensions = array<i32: 1>} : vector<16x128xi32>
    %c8_i32 = arith.constant 8 : i32
    %10 = vector.broadcast %c8_i32 : i32 to vector<16x128xi32>
    %11 = arith.cmpi slt, %9, %10 : vector<16x128xi32>
    %cst_8 = arith.constant -1.000000e+30 : f32
    %12 = vector.broadcast %cst_8 : f32 to vector<16x128xf32>
    %13 = arith.select %11, %8, %12 : vector<16x128xi1>, vector<16x128xf32>
    %cst_9 = arith.constant dense<0xFF800000> : vector<16xf32>
    %14 = vector.multi_reduction <maximumf>, %13, %cst_9 [1] : vector<16x128xf32> to vector<16xf32>
    %15 = vector.shape_cast %14 : vector<16xf32> to vector<16x1xf32>
    %16 = vector.broadcast %15 : vector<16x1xf32> to vector<16x128xf32>
    %17 = arith.subf %13, %16 : vector<16x128xf32>
    %18 = math.exp %17 : vector<16x128xf32>
    %cst_10 = arith.constant dense<0.000000e+00> : vector<16xf32>
    %19 = vector.multi_reduction <add>, %18, %cst_10 [1] : vector<16x128xf32> to vector<16xf32>
    %20 = vector.shape_cast %19 : vector<16xf32> to vector<16x1xf32>
    %21 = tpu.reciprocal %20 {approx = true} : vector<16x1xf32> -> vector<16x1xf32>
    %22 = vector.broadcast %21 : vector<16x1xf32> to vector<16x128xf32>
    %23 = arith.mulf %18, %22 : vector<16x128xf32>
    %c0_11 = arith.constant 0 : index
    %c0_12 = arith.constant 0 : index
    %24 = vector.load %arg7[%c0_11, %c0_12] : memref<16x128xf32, #tpu.memory_space<vmem>>, vector<16x128xf32>
    tpu.vector_store %arg7[%c0_11, %c0_12], %23 {strides = array<i32>} : memref<16x128xf32, #tpu.memory_space<vmem>>, vector<16x128xf32>,
    %25 = arith.truncf %23 : vector<16x128xf32> to vector<16x128xbf16>
    %c0_13 = arith.constant 0 : index
    %c0_14 = arith.constant 0 : index
    %26 = vector.load %arg5[%c0_13, %c0_14] : memref<128x128xbf16, #tpu.memory_space<vmem>>, vector<128x128xbf16>
    %cst_15 = arith.constant dense<0.000000e+00> : vector<16x128xf32>
    %27 = tpu.matmul %25, %26, %cst_15 {dimension_numbers = #tpu.dot_dimension_numbers<[1], [0], [0], [1], [0, 0, 1, 1], [], []>} : vector<16x128xbf16>, vector<128x128xbf16>, vector<16x128xf32> -> vector<16x128xf32>
    %c0_16 = arith.constant 0 : index
    %c0_17 = arith.constant 0 : index
    %28 = vector.load %arg6[%c0_16, %c0_17] : memref<16x128xf32, #tpu.memory_space<vmem>>, vector<16x128xf32>
    tpu.vector_store %arg6[%c0_16, %c0_17], %27 {strides = array<i32>} : memref<16x128xf32, #tpu.memory_space<vmem>>, vector<16x128xf32>,
    return
  }
  func.func @transform_0(%arg0: i32) -> (i32, i32) {
    %c0_i32 = arith.constant 0 : i32
    %c0_i32_0 = arith.constant 0 : i32
    return %arg0, %c0_i32 : i32, i32
  }
  func.func @transform_1(%arg0: i32) -> (i32, i32) {
    %c0_i32 = arith.constant 0 : i32
    %c0_i32_0 = arith.constant 0 : i32
    %c0_i32_1 = arith.constant 0 : i32
    return %c0_i32, %c0_i32_0 : i32, i32
  }
  func.func @transform_2(%arg0: i32) -> (i32, i32) {
    %c0_i32 = arith.constant 0 : i32
    %c0_i32_0 = arith.constant 0 : i32
    %c0_i32_1 = arith.constant 0 : i32
    return %c0_i32, %c0_i32_0 : i32, i32
  }
  func.func @transform_3(%arg0: i32) -> (i32, i32) {
    %c0_i32 = arith.constant 0 : i32
    %c0_i32_0 = arith.constant 0 : i32
    %c0_i32_1 = arith.constant 0 : i32
    return %c0_i32, %c0_i32_0 : i32, i32
  }
  func.func @transform_4(%arg0: i32) -> (i32, i32) {
    %c0_i32 = arith.constant 0 : i32
    %c0_i32_0 = arith.constant 0 : i32
    %c0_i32_1 = arith.constant 0 : i32
    return %c0_i32, %c0_i32_0 : i32, i32
  }
  func.func @transform_5(%arg0: i32) -> (i32, i32) {
    %c0_i32 = arith.constant 0 : i32
    %c0_i32_0 = arith.constant 0 : i32
    return %arg0, %c0_i32 : i32, i32
  }
  func.func @transform_6(%arg0: i32) -> (i32, i32) {
    %c0_i32 = arith.constant 0 : i32
    %c0_i32_0 = arith.constant 0 : i32
    return %arg0, %c0_i32 : i32, i32
  }
}

</mosaic_0001>

<bundles_post_ra>
// kernel: attention_layer.3
= control target key start
LH: loop header
LB: loop body
LE: loop exit
PB: predicated region body
PF: predicated region fallthrough
CT: control target
= control target key end

     0   :  { %v538_v0 = vmov 0.0   ;;  %vm539_vm0 = vmmov 0   ;;  %v249_v26 = vlaneseq  ;;  %s695_s1 = inlined_call_operand.vmem [shape: bf16[128,128], index: 1, kind: input, shape index: {}]   ;;  %s696_s3 = inlined_call_operand.vmem [shape: bf16[128,128], index: 3, kind: input, shape index: {}]   ;;  %s697_s0 = inlined_call_operand.vmem [shape: bf16[16,128], index: 0, kind: input, shape index: {}]   ;;  %s698_s2 = inlined_call_operand.vmem [shape: f32[1,128], index: 2, kind: input, shape index: {}]   ;;  %s699_s4 = inlined_call_operand.vmem [shape: bf16[128,128], index: 4, kind: input, shape index: {}]   ;;  %s700_s6 = inlined_call_operand.vmem [shape: f32[16,128], index: 6, kind: output, shape index: {1}]   ;;  %s701_s5 = inlined_call_operand.vmem [shape: f32[16,128], index: 5, kind: output, shape index: {0}]  }
   0x1   :  { %443 = vmatprep.subr.bf16.mxu0 %v538_v0  ;;  %v505_v1 = vld [vmem:[%s695_s1 + $0x38] sm:$0xff]   ;;  %459 = vmatprep.mubr.msk.bf16.mxu0 %vm539_vm0, %v538_v0  ;;  %v506_v2 = vld [vmem:[%s695_s1 + $0x30] sm:$0xff]   ;;  %v507_v3 = vld [vmem:[%s695_s1 + $0x28] sm:$0xff]  }
   0x2   :  { %463 = vmatprep.subr.bf16.mxu1 %v538_v0  ;;  %479 = vmatprep.mubr.msk.bf16.mxu1 %vm539_vm0, %v538_v0  ;;  %v514_v4 = vld [vmem:[%s696_s3 + $0x38] sm:$0xff]   ;;  %v508_v5 = vld [vmem:[%s695_s1 + $0x20] sm:$0xff]   ;;  %v515_v7 = vld [vmem:[%s696_s3 + $0x30] sm:$0xff]   ;;  %v250_v27 = vand.u32 127, %v249_v26 }
   0x3   :  { %444 = vmatpush3.bf16.msra.mxu0 %v505_v1  ;;  %464 = vmatpush3.bf16.xpose.msra.mxu1 %v514_v4  ;;  %v509_v6 = vld [vmem:[%s695_s1 + $0x18] sm:$0xff]   ;;  %v510_v8 = vld [vmem:[%s695_s1 + $0x10] sm:$0xff]   ;;  %v511_v9 = vld [vmem:[%s695_s1 + $0x8] sm:$0xff]  }
   0x4   :  { %445 = vmatprep.subr.bf16.mxu0 %v538_v0  ;;  %465 = vmatprep.subr.bf16.mxu1 %v538_v0  ;;  %v516_v10 = vld [vmem:[%s696_s3 + $0x28] sm:$0xff]   ;;  %v512_v11 = vld [vmem:[%s695_s1] sm:$0xff]   ;;  %v518_v14 = vld [vmem:[%s696_s3 + $0x18] sm:$0xff]   ;;  %vm251_vm1 = vcmp.lt.s32.totalorder %v250_v27, 8 }
   0x5   :  { %v513_v12 = vld [vmem:[%s697_s0] sm:$0xff]   ;;  %v519_v15 = vld [vmem:[%s696_s3 + $0x10] sm:$0xff]   ;;  %v520_v16 = vld [vmem:[%s696_s3 + $0x8] sm:$0xff]  }
   0x6   :  { %v517_v13 = vld [vmem:[%s696_s3 + $0x20] sm:$0xff]   ;;  %v522_v34 = vld [vmem:[%s699_s4 + $0x38] sm:$0xff]   ;;  %v523_v35 = vld [vmem:[%s699_s4 + $0x30] sm:$0xff]  }
   0x7   :  { %446 = vmatpush3.bf16.msra.mxu0 %v506_v2  ;;  %v521_v17 = vld [vmem:[%s696_s3] sm:$0xff]   ;;  %v524_v36 = vld [vmem:[%s699_s4 + $0x28] sm:$0xff]   ;;  %v526_v46 = vld [vmem:[%s699_s4 + $0x18] sm:$0xff]  }
   0x8   :  { %447 = vmatprep.subr.bf16.mxu0 %v538_v0  ;;  %v390_v19 = vld [vmem:[%s698_s2] ss:$0 sm:$0xff]  ;;  %v527_v47 = vld [vmem:[%s699_s4 + $0x10] sm:$0xff]   ;;  %v528_v48 = vld [vmem:[%s699_s4 + $0x8] sm:$0xff]  }
   0x9   :  { %v525_v45 = vld [vmem:[%s699_s4 + $0x20] sm:$0xff]  }
   0xa   :  { %v529_v49 = vld [vmem:[%s699_s4] sm:$0xff]  }
   0xb   :  { %448 = vmatpush3.bf16.msra.mxu0 %v507_v3  ;;  %466 = vmatpush3.bf16.xpose.msra.mxu1 %v515_v7 }
   0xc   :  { %449 = vmatprep.subr.bf16.mxu0 %v538_v0  ;;  %467 = vmatprep.subr.bf16.mxu1 %v538_v0 }
   0xf   :  { %450 = vmatpush3.bf16.msra.mxu0 %v508_v5 }
  0x10   :  { %451 = vmatprep.subr.bf16.mxu0 %v538_v0 }
  0x13   :  { %452 = vmatpush3.bf16.msra.mxu0 %v509_v6  ;;  %468 = vmatpush3.bf16.xpose.msra.mxu1 %v516_v10 }
  0x14   :  { %453 = vmatprep.subr.bf16.mxu0 %v538_v0  ;;  %469 = vmatprep.subr.bf16.mxu1 %v538_v0 }
  0x17   :  { %454 = vmatpush3.bf16.msra.mxu0 %v510_v8 }
  0x18   :  { %455 = vmatprep.subr.bf16.mxu0 %v538_v0 }
  0x1b   :  { %456 = vmatpush3.bf16.msra.mxu0 %v511_v9  ;;  %470 = vmatpush3.bf16.xpose.msra.mxu1 %v517_v13 }
  0x1c   :  { %457 = vmatprep.subr.bf16.mxu0 %v538_v0  ;;  %471 = vmatprep.subr.bf16.mxu1 %v538_v0 }
  0x1f   :  { %458 = vmatpush3.bf16.msra.mxu0 %v512_v11 }
  0x20   :  { %483 = vmatprep.subr.bf16.mxu0 %v538_v0 }
  0x22   :  { %460 = vmatmul.mubr.bf16.vlgmr.msra.gmra.mxu0 %v513_v12 }
  0x23   :  { %499 = vmatprep.mubr.msk.bf16.mxu0 %vm539_vm0, %v538_v0  ;;  %472 = vmatpush3.bf16.xpose.msra.mxu1 %v518_v14 }
  0x24   :  { %473 = vmatprep.subr.bf16.mxu1 %v538_v0  ;;  %484 = vmatpush3.bf16.msra.mxu0 %v522_v34 }
  0x25   :  { %485 = vmatprep.subr.bf16.mxu0 %v538_v0 }
  0x28   :  { %486 = vmatpush3.bf16.msra.mxu0 %v523_v35 }
  0x29   :  { %487 = vmatprep.subr.bf16.mxu0 %v538_v0 }
  0x2b   :  { %474 = vmatpush3.bf16.xpose.msra.mxu1 %v519_v15 }
  0x2c   :  { %475 = vmatprep.subr.bf16.mxu1 %v538_v0  ;;  %488 = vmatpush3.bf16.msra.mxu0 %v524_v36 }
  0x2d   :  { %489 = vmatprep.subr.bf16.mxu0 %v538_v0 }
  0x30   :  { %490 = vmatpush3.bf16.msra.mxu0 %v525_v45 }
  0x31   :  { %491 = vmatprep.subr.bf16.mxu0 %v538_v0 }
  0x33   :  { %476 = vmatpush3.bf16.xpose.msra.mxu1 %v520_v16 }
  0x34   :  { %477 = vmatprep.subr.bf16.mxu1 %v538_v0  ;;  %492 = vmatpush3.bf16.msra.mxu0 %v526_v46 }
  0x35   :  { %493 = vmatprep.subr.bf16.mxu0 %v538_v0 }
  0x38   :  { %494 = vmatpush3.bf16.msra.mxu0 %v527_v47 }
  0x39   :  { %495 = vmatprep.subr.bf16.mxu0 %v538_v0 }
  0x3b   :  { %478 = vmatpush3.bf16.xpose.msra.mxu1 %v521_v17 }
  0x3c   :  { %496 = vmatpush3.bf16.msra.mxu0 %v528_v48 }
  0x3d   :  { %497 = vmatprep.subr.bf16.mxu0 %v538_v0 }
  0x40   :  { %498 = vmatpush3.bf16.msra.mxu0 %v529_v49 }
  0xe2   :  { %v136_v18 = vpop.f32.mrf.mxu0 }
  0xe3   :  { %v137_v22 = vadd.f32 %v390_v19, %v136_v18 }
  0xe4   :  { %v461_v20 = vpop.f32.mrf.mxu0 }
  0xe6   :  { %v139_v21 = vpop.f32.mrf.mxu0 }
  0xe7   :  { %v140_v23 = vadd.f32 %v390_v19, %v139_v21 }
  0xe8   :  { %v462_v24 = vpop.f32.mrf.mxu0 }
  0xe9   :  { %v143_v25 = vpack.c.bf16 %v140_v23, %v137_v22 }
  0xeb   :  { %480 = vmatmul.mubr.bf16.vlgmr.msra.gmra.mxu1 %v143_v25 }
 0x1ab   :  { %v242_v28 = vpop.f32.mrf.mxu1 }
 0x1ac   :  { %v252_v29 = vsel %vm251_vm1, %v242_v28, -1e+30 }
 0x1ad   :  { %254 = vmax.xlane.f32.xlu0 %v252_v29  ;;  %v481_v30 = vpop.f32.mrf.mxu1 }
 0x1af   :  { %v245_v31 = vpop.f32.mrf.mxu1 }
 0x1b0   :  { %v253_v32 = vsel %vm251_vm1, %v245_v31, -1e+30 }
 0x1b1   :  { %256 = vmax.xlane.f32.xlu0 %v253_v32  ;;  %v482_v33 = vpop.f32.mrf.mxu1 }
 0x236   :  { %v255_v37 = vpop.xlane.xlu0 %254 }
 0x237   :  { %v258_v38 = vsub.f32 %v252_v29, %v255_v37 }
 0x239   :  { %v260_v39 = vmul.f32 1.442695, %v258_v38 }
 0x23a   :  { %v257_v40 = vpop.xlane.xlu0 %256 }
 0x23b   :  { %530 = vpow2.f32 %v260_v39  ;;  %v259_v41 = vsub.f32 %v253_v32, %v257_v40 }
 0x23d   :  { %v262_v42 = vmul.f32 1.442695, %v259_v41 }
 0x23f   :  { %532 = vpow2.f32 %v262_v42 }
 0x248   :  { %v531_v43 = vpop.eup %530 }
 0x249   :  { %264 = vadd.xlane.f32.xlu1 %v531_v43 }
 0x24c   :  { %v533_v44 = vpop.eup %532 }
 0x24d   :  { %266 = vadd.xlane.f32.xlu1 %v533_v44 }
 0x2d2   :  { %v265_v50 = vpop.xlane.xlu1 %264 }
 0x2d3   :  { %534 = vrcp.f32 %v265_v50 }
 0x2d6   :  { %v267_v51 = vpop.xlane.xlu1 %266 }
 0x2d7   :  { %536 = vrcp.f32 %v267_v51 }
 0x2e0   :  { %v535_v52 = vpop.eup %534 }
 0x2e1   :  { %v270_v53 = vmul.f32 %v535_v52, %v531_v43 }
 0x2e3   :  { %272 = vst [vmem:[%s700_s6] sm:$0xff] %v270_v53 }
 0x2e4   :  { %v537_v54 = vpop.eup %536 }
 0x2e5   :  { %v271_v55 = vmul.f32 %v537_v54, %v533_v44 }
 0x2e7   :  { %273 = vst [vmem:[%s700_s6 + $0x8] sm:$0xff] %v271_v55  ;;  %v274_v56 = vpack.c.bf16 %v271_v55, %v270_v53 }
 0x2e9   :  { %500 = vmatmul.mubr.bf16.vlgmr.msra.gmra.mxu0 %v274_v56 }
 0x3a9   :  { %v373_v57 = vpop.f32.mrf.mxu0 }
 0x3aa   :  { %380 = vst [vmem:[%s701_s5] sm:$0xff] %v373_v57 }
 0x3ab   :  { %v501_v58 = vpop.f32.mrf.mxu0 }
 0x3ad   :  { %v376_v59 = vpop.f32.mrf.mxu0 }
 0x3ae   :  { %381 = vst [vmem:[%s701_s5 + $0x8] sm:$0xff] %v376_v59 }
 0x3af   :  { %v502_v60 = vpop.f32.mrf.mxu0 }

// kernel: attention_layer.2
= control target key start
LH: loop header
LB: loop body
LE: loop exit
PB: predicated region body
PF: predicated region fallthrough
CT: control target
= control target key end

     0   :  { %s1204_s2 = inlined_call_operand.vmem [shape: bf16[128,128], index: 2, kind: input, shape index: {}]   ;;  %s1205_s4 = inlined_call_operand.vmem [shape: bf16[128,128], index: 4, kind: input, shape index: {}]   ;;  %s1206_s0 = inlined_call_operand.vmem [shape: bf16[128,128], index: 0, kind: input, shape index: {}]   ;;  %s1207_s1 = inlined_call_operand.vmem [shape: bf16[128,128], index: 1, kind: input, shape index: {}]   ;;  %s1208_s3 = inlined_call_operand.vmem [shape: f32[1,128], index: 3, kind: input, shape index: {}]   ;;  %s1209_s5 = inlined_call_operand.vmem [shape: f32[1,128], index: 5, kind: input, shape index: {}]   ;;  %s1210_s6 = inlined_call_operand.vmem [shape: bf16[128,128], index: 6, kind: output, shape index: {0}]   ;;  %s1211_s7 = inlined_call_operand.vmem [shape: bf16[128,128], index: 7, kind: output, shape index: {1}]  }
   0x1   :  { %v946_v0 = vld [vmem:[%s1204_s2 + $0x38] sm:$0xff]   ;;  %v948_v2 = vld [vmem:[%s1204_s2 + $0x30] sm:$0xff]   ;;  %v950_v4 = vld [vmem:[%s1204_s2 + $0x28] sm:$0xff]  }
   0x2   :  { %v947_v1 = vld [vmem:[%s1205_s4 + $0x38] sm:$0xff]   ;;  %882 = vmatprep.subr.bf16.mxu0 %v946_v0  ;;  %v949_v3 = vld [vmem:[%s1205_s4 + $0x30] sm:$0xff]   ;;  %v951_v5 = vld [vmem:[%s1205_s4 + $0x28] sm:$0xff]  }
   0x3   :  { %914 = vmatprep.subr.bf16.mxu1 %v947_v1  ;;  %883 = vmatpush3.bf16.msra.mxu0 %v946_v0  ;;  %v952_v6 = vld [vmem:[%s1204_s2 + $0x20] sm:$0xff]   ;;  %v954_v8 = vld [vmem:[%s1204_s2 + $0x18] sm:$0xff]   ;;  %v956_v10 = vld [vmem:[%s1204_s2 + $0x10] sm:$0xff]  }
   0x4   :  { %915 = vmatpush3.bf16.msra.mxu1 %v947_v1  ;;  %884 = vmatprep.subr.bf16.mxu0 %v948_v2  ;;  %v953_v7 = vld [vmem:[%s1205_s4 + $0x20] sm:$0xff]   ;;  %v955_v9 = vld [vmem:[%s1205_s4 + $0x18] sm:$0xff]   ;;  %v957_v11 = vld [vmem:[%s1205_s4 + $0x10] sm:$0xff]  }
   0x5   :  { %916 = vmatprep.subr.bf16.mxu1 %v949_v3  ;;  %v962_v12 = vld [vmem:[%s1206_s0] sm:$0xff]   ;;  %v958_v14 = vld [vmem:[%s1204_s2 + $0x8] sm:$0xff]   ;;  %v966_v20 = vld [vmem:[%s1206_s0 + $0x10] sm:$0xff]  }
   0x6   :  { %v963_v13 = vld [vmem:[%s1207_s1] sm:$0xff]   ;;  %898 = vmatprep.mubr.bf16.mxu0 %v962_v12  ;;  %v959_v15 = vld [vmem:[%s1205_s4 + $0x8] sm:$0xff]   ;;  %v967_v21 = vld [vmem:[%s1207_s1 + $0x10] sm:$0xff]  }
   0x7   :  { %885 = vmatpush3.bf16.msra.mxu0 %v948_v2  ;;  %930 = vmatprep.mubr.bf16.mxu1 %v963_v13  ;;  %v960_v16 = vld [vmem:[%s1204_s2] sm:$0xff]   ;;  %v964_v18 = vld [vmem:[%s1206_s0 + $0x8] sm:$0xff]   ;;  %v968_v22 = vld [vmem:[%s1206_s0 + $0x18] sm:$0xff]  }
   0x8   :  { %917 = vmatpush3.bf16.msra.mxu1 %v949_v3  ;;  %886 = vmatprep.subr.bf16.mxu0 %v950_v4  ;;  %v961_v17 = vld [vmem:[%s1205_s4] sm:$0xff]   ;;  %v965_v19 = vld [vmem:[%s1207_s1 + $0x8] sm:$0xff]   ;;  %v969_v23 = vld [vmem:[%s1207_s1 + $0x18] sm:$0xff]  }
   0x9   :  { %918 = vmatprep.subr.bf16.mxu1 %v951_v5  ;;  %v970_v24 = vld [vmem:[%s1206_s0 + $0x20] sm:$0xff]   ;;  %v972_v26 = vld [vmem:[%s1206_s0 + $0x28] sm:$0xff]   ;;  %v974_v28 = vld [vmem:[%s1206_s0 + $0x30] sm:$0xff]  }
   0xa   :  { %v971_v25 = vld [vmem:[%s1207_s1 + $0x20] sm:$0xff]   ;;  %v973_v27 = vld [vmem:[%s1207_s1 + $0x28] sm:$0xff]   ;;  %v975_v29 = vld [vmem:[%s1207_s1 + $0x30] sm:$0xff]  }
   0xb   :  { %887 = vmatpush3.bf16.msra.mxu0 %v950_v4  ;;  %v976_v30 = vld [vmem:[%s1206_s0 + $0x38] sm:$0xff]   ;;  %v1117_v34 = vld [vmem:[%s1208_s3] ss:$0 sm:$0xff] }
   0xc   :  { %919 = vmatpush3.bf16.msra.mxu1 %v951_v5  ;;  %888 = vmatprep.subr.bf16.mxu0 %v952_v6  ;;  %v977_v31 = vld [vmem:[%s1207_s1 + $0x38] sm:$0xff]   ;;  %v1122_v36 = vld [vmem:[%s1209_s5] ss:$0 sm:$0xff] }
   0xd   :  { %920 = vmatprep.subr.bf16.mxu1 %v953_v7 }
   0xf   :  { %889 = vmatpush3.bf16.msra.mxu0 %v952_v6 }
  0x10   :  { %921 = vmatpush3.bf16.msra.mxu1 %v953_v7  ;;  %890 = vmatprep.subr.bf16.mxu0 %v954_v8 }
  0x11   :  { %922 = vmatprep.subr.bf16.mxu1 %v955_v9 }
  0x13   :  { %891 = vmatpush3.bf16.msra.mxu0 %v954_v8 }
  0x14   :  { %923 = vmatpush3.bf16.msra.mxu1 %v955_v9  ;;  %892 = vmatprep.subr.bf16.mxu0 %v956_v10 }
  0x15   :  { %924 = vmatprep.subr.bf16.mxu1 %v957_v11 }
  0x17   :  { %893 = vmatpush3.bf16.msra.mxu0 %v956_v10 }
  0x18   :  { %925 = vmatpush3.bf16.msra.mxu1 %v957_v11  ;;  %894 = vmatprep.subr.bf16.mxu0 %v958_v14 }
  0x19   :  { %926 = vmatprep.subr.bf16.mxu1 %v959_v15 }
  0x1b   :  { %895 = vmatpush3.bf16.msra.mxu0 %v958_v14 }
  0x1c   :  { %927 = vmatpush3.bf16.msra.mxu1 %v959_v15  ;;  %896 = vmatprep.subr.bf16.mxu0 %v960_v16 }
  0x1d   :  { %928 = vmatprep.subr.bf16.mxu1 %v961_v17 }
  0x1f   :  { %897 = vmatpush3.bf16.msra.mxu0 %v960_v16 }
  0x20   :  { %929 = vmatpush3.bf16.msra.mxu1 %v961_v17 }
  0x22   :  { %899 = vmatmul.mubr.bf16.vlgmr.msra.gmra.mxu0 %v964_v18 }
  0x23   :  { %931 = vmatmul.mubr.bf16.vlgmr.msra.gmra.mxu1 %v965_v19  ;;  %902 = vmatprep.mubr.bf16.mxu0 %v966_v20 }
  0x24   :  { %934 = vmatprep.mubr.bf16.mxu1 %v967_v21 }
  0x2a   :  { %903 = vmatmul.mubr.bf16.gmra.mxu0 %v968_v22 }
  0x2b   :  { %935 = vmatmul.mubr.bf16.gmra.mxu1 %v969_v23  ;;  %906 = vmatprep.mubr.bf16.mxu0 %v970_v24 }
  0x2c   :  { %938 = vmatprep.mubr.bf16.mxu1 %v971_v25 }
  0x32   :  { %907 = vmatmul.mubr.bf16.gmra.mxu0 %v972_v26 }
  0x33   :  { %939 = vmatmul.mubr.bf16.gmra.mxu1 %v973_v27  ;;  %910 = vmatprep.mubr.bf16.mxu0 %v974_v28 }
  0x34   :  { %942 = vmatprep.mubr.bf16.mxu1 %v975_v29 }
  0x3a   :  { %911 = vmatmul.mubr.bf16.gmra.mxu0 %v976_v30 }
  0x3b   :  { %943 = vmatmul.mubr.bf16.gmra.mxu1 %v977_v31 }
  0xe2   :  { %v900_v32 = vpop.f32.mrf.mxu0 }
  0xe3   :  { %v932_v33 = vpop.f32.mrf.mxu1  ;;  %v204_v39 = vadd.f32 %v900_v32, %v1117_v34 }
  0xe4   :  { %v195_v35 = vpop.f32.mrf.mxu0  ;;  %v436_v42 = vadd.f32 %v932_v33, %v1122_v36 }
  0xe5   :  { %v427_v37 = vpop.f32.mrf.mxu1  ;;  %v196_v45 = vadd.f32 %v1117_v34, %v195_v35 }
  0xe6   :  { %v901_v38 = vpop.f32.mrf.mxu0  ;;  %v428_v49 = vadd.f32 %v1122_v36, %v427_v37 }
  0xe7   :  { %v207_v40 = vadd.f32 %v901_v38, %v1117_v34  ;;  %v933_v41 = vpop.f32.mrf.mxu1 }
  0xe8   :  { %v439_v43 = vadd.f32 %v933_v41, %v1122_v36  ;;  %v198_v44 = vpop.f32.mrf.mxu0 }
  0xe9   :  { %v764_v46 = vpack.c.bf16 %v207_v40, %v204_v39  ;;  %v199_v47 = vadd.f32 %v1117_v34, %v198_v44  ;;  %v430_v48 = vpop.f32.mrf.mxu1 }
  0xea   :  { %v804_v50 = vpack.c.bf16 %v439_v43, %v436_v42  ;;  %v431_v51 = vadd.f32 %v1122_v36, %v430_v48  ;;  %v904_v52 = vpop.f32.mrf.mxu0 }
  0xeb   :  { %836 = vst [vmem:[%s1210_s6 + $0x8] sm:$0xff] %v764_v46   ;;  %v759_v53 = vpack.c.bf16 %v199_v47, %v196_v45  ;;  %v936_v54 = vpop.f32.mrf.mxu1  ;;  %v220_v59 = vadd.f32 %v904_v52, %v1117_v34 }
  0xec   :  { %843 = vst [vmem:[%s1211_s7 + $0x8] sm:$0xff] %v804_v50   ;;  %v799_v55 = vpack.c.bf16 %v431_v51, %v428_v49  ;;  %v211_v56 = vpop.f32.mrf.mxu0  ;;  %v452_v62 = vadd.f32 %v936_v54, %v1122_v36 }
  0xed   :  { %760 = vst [vmem:[%s1210_s6] sm:$0xff] %v759_v53   ;;  %v443_v57 = vpop.f32.mrf.mxu1  ;;  %v212_v1 = vadd.f32 %v1117_v34, %v211_v56 }
  0xee   :  { %800 = vst [vmem:[%s1211_s7] sm:$0xff] %v799_v55   ;;  %v905_v58 = vpop.f32.mrf.mxu0  ;;  %v444_v5 = vadd.f32 %v1122_v36, %v443_v57 }
  0xef   :  { %v223_v60 = vadd.f32 %v905_v58, %v1117_v34  ;;  %v937_v61 = vpop.f32.mrf.mxu1 }
  0xf0   :  { %v455_v63 = vadd.f32 %v937_v61, %v1122_v36  ;;  %v214_v0 = vpop.f32.mrf.mxu0 }
  0xf1   :  { %v774_v2 = vpack.c.bf16 %v223_v60, %v220_v59  ;;  %v215_v3 = vadd.f32 %v1117_v34, %v214_v0  ;;  %v446_v4 = vpop.f32.mrf.mxu1 }
  0xf2   :  { %v814_v6 = vpack.c.bf16 %v455_v63, %v452_v62  ;;  %v447_v7 = vadd.f32 %v1122_v36, %v446_v4  ;;  %v908_v8 = vpop.f32.mrf.mxu0 }
  0xf3   :  { %838 = vst [vmem:[%s1210_s6 + $0x18] sm:$0xff] %v774_v2   ;;  %v769_v9 = vpack.c.bf16 %v215_v3, %v212_v1  ;;  %v940_v10 = vpop.f32.mrf.mxu1  ;;  %v236_v15 = vadd.f32 %v908_v8, %v1117_v34 }
  0xf4   :  { %845 = vst [vmem:[%s1211_s7 + $0x18] sm:$0xff] %v814_v6   ;;  %v809_v11 = vpack.c.bf16 %v447_v7, %v444_v5  ;;  %v227_v12 = vpop.f32.mrf.mxu0  ;;  %v468_v18 = vadd.f32 %v940_v10, %v1122_v36 }
  0xf5   :  { %837 = vst [vmem:[%s1210_s6 + $0x10] sm:$0xff] %v769_v9   ;;  %v459_v13 = vpop.f32.mrf.mxu1  ;;  %v228_v21 = vadd.f32 %v1117_v34, %v227_v12 }
  0xf6   :  { %844 = vst [vmem:[%s1211_s7 + $0x10] sm:$0xff] %v809_v11   ;;  %v909_v14 = vpop.f32.mrf.mxu0  ;;  %v460_v25 = vadd.f32 %v1122_v36, %v459_v13 }
  0xf7   :  { %v239_v16 = vadd.f32 %v909_v14, %v1117_v34  ;;  %v941_v17 = vpop.f32.mrf.mxu1 }
  0xf8   :  { %v471_v19 = vadd.f32 %v941_v17, %v1122_v36  ;;  %v230_v20 = vpop.f32.mrf.mxu0 }
  0xf9   :  { %v784_v22 = vpack.c.bf16 %v239_v16, %v236_v15  ;;  %v231_v23 = vadd.f32 %v1117_v34, %v230_v20  ;;  %v462_v24 = vpop.f32.mrf.mxu1 }
  0xfa   :  { %v824_v26 = vpack.c.bf16 %v471_v19, %v468_v18  ;;  %v463_v27 = vadd.f32 %v1122_v36, %v462_v24  ;;  %v912_v28 = vpop.f32.mrf.mxu0 }
  0xfb   :  { %840 = vst [vmem:[%s1210_s6 + $0x28] sm:$0xff] %v784_v22   ;;  %v779_v29 = vpack.c.bf16 %v231_v23, %v228_v21  ;;  %v944_v30 = vpop.f32.mrf.mxu1  ;;  %v252_v37 = vadd.f32 %v912_v28, %v1117_v34 }
  0xfc   :  { %847 = vst [vmem:[%s1211_s7 + $0x28] sm:$0xff] %v824_v26   ;;  %v819_v31 = vpack.c.bf16 %v463_v27, %v460_v25  ;;  %v243_v32 = vpop.f32.mrf.mxu0  ;;  %v484_v40 = vadd.f32 %v944_v30, %v1122_v36 }
  0xfd   :  { %839 = vst [vmem:[%s1210_s6 + $0x20] sm:$0xff] %v779_v29   ;;  %v475_v33 = vpop.f32.mrf.mxu1  ;;  %v244_v43 = vadd.f32 %v1117_v34, %v243_v32 }
  0xfe   :  { %846 = vst [vmem:[%s1211_s7 + $0x20] sm:$0xff] %v819_v31   ;;  %v913_v35 = vpop.f32.mrf.mxu0  ;;  %v476_v47 = vadd.f32 %v1122_v36, %v475_v33 }
  0xff   :  { %v255_v38 = vadd.f32 %v913_v35, %v1117_v34  ;;  %v945_v39 = vpop.f32.mrf.mxu1 }
 0x100   :  { %v487_v41 = vadd.f32 %v945_v39, %v1122_v36  ;;  %v246_v42 = vpop.f32.mrf.mxu0 }
 0x101   :  { %v794_v44 = vpack.c.bf16 %v255_v38, %v252_v37  ;;  %v247_v45 = vadd.f32 %v1117_v34, %v246_v42  ;;  %v478_v46 = vpop.f32.mrf.mxu1 }
 0x102   :  { %v834_v48 = vpack.c.bf16 %v487_v41, %v484_v40  ;;  %v479_v49 = vadd.f32 %v1122_v36, %v478_v46 }
 0x103   :  { %842 = vst [vmem:[%s1210_s6 + $0x38] sm:$0xff] %v794_v44   ;;  %v789_v50 = vpack.c.bf16 %v247_v45, %v244_v43 }
 0x104   :  { %849 = vst [vmem:[%s1211_s7 + $0x38] sm:$0xff] %v834_v48   ;;  %v829_v51 = vpack.c.bf16 %v479_v49, %v476_v47 }
 0x105   :  { %841 = vst [vmem:[%s1210_s6 + $0x30] sm:$0xff] %v789_v50  }
 0x106   :  { %848 = vst [vmem:[%s1211_s7 + $0x30] sm:$0xff] %v829_v51  }

</bundles_post_ra>
